<compile_context>
chip_gen: v5e
topology: v5e:2x2
jax: 0.10.0
libtpu: 0.0.40
codegen_flags: <defaults>
</compile_context>

<pallas_src>
import functools
import math

import jax
import jax.numpy as jnp
from jax import lax
from jax.experimental import pallas as pl
from jax.experimental.pallas import tpu as pltpu


def _ls_partial_kernel(pred_ref, tgt_ref, loss_ref, cnt_ref, *, smoothing,
                       pad_idx, vocab, n_rows):
    """Per-tile partial (masked loss sum, valid-token count) for mean/sum.

    pred_ref : (TN, V) logits / log-probs (any float dtype)
    tgt_ref  : (TN, 1) int32 targets
    loss_ref : (8, 1)  f32 partial loss sum (sublane 0)
    cnt_ref  : (8, 1)  f32 partial non-pad token count (sublane 0)
    """
    p = pred_ref[...].astype(jnp.float32)                 # (TN, V)
    tn, v = p.shape

    # log-softmax pieces -- log_q itself is never materialized:
    #   log_q = p - (m + lse)
    m = jnp.max(p, axis=-1, keepdims=True)                # (TN, 1)
    lse = jnp.log(jnp.sum(jnp.exp(p - m), axis=-1, keepdims=True))
    m_lse = m + lse

    sum_p = jnp.sum(p, axis=-1, keepdims=True)            # (TN, 1)
    tgt = tgt_ref[...]                                     # (TN, 1) int32
    ids = lax.broadcasted_iota(jnp.int32, (tn, v), 1)
    tgt_p = jnp.sum(jnp.where(ids == tgt, p, 0.0), axis=-1, keepdims=True)

    sum_logq = sum_p - float(v) * m_lse                    # sum_v log_q
    tgt_logq = tgt_p - m_lse                               # log_q[target]

    # Trace-time constants (xlogy convention: 0*log(0) = 0).
    eps = smoothing / vocab
    conf = 1.0 - smoothing + eps
    h_const = 0.0
    if conf > 0.0:
        h_const += conf * math.log(conf)
    if eps > 0.0:
        h_const += (vocab - 1) * eps * math.log(eps)

    # Mask pad targets and (ragged last tile) out-of-range rows.
    row_idx = pl.program_id(0) * tn + lax.broadcasted_iota(jnp.int32, (tn, 1), 0)
    valid = (tgt != pad_idx) & (row_idx < n_rows)

    row_loss = h_const - eps * sum_logq - (1.0 - smoothing) * tgt_logq
    row_loss = jnp.where(valid, row_loss, 0.0)             # where: kills NaN garbage rows

    tile_loss = jnp.sum(row_loss, axis=0, keepdims=True)                     # (1, 1)
    tile_cnt = jnp.sum(valid.astype(jnp.float32), axis=0, keepdims=True)     # (1, 1)

    sub0 = lax.broadcasted_iota(jnp.int32, (8, 1), 0) == 0
    loss_ref[...] = jnp.where(sub0, tile_loss, 0.0)
    cnt_ref[...] = jnp.where(sub0, tile_cnt, 0.0)


def _ls_elem_kernel(pred_ref, tgt_ref, loss_ref, *, smoothing, pad_idx, vocab):
    """Full elementwise masked KL loss (reduction='none')."""
    p = pred_ref[...].astype(jnp.float32)                  # (TN, V)
    tn, v = p.shape

    m = jnp.max(p, axis=-1, keepdims=True)
    lse = jnp.log(jnp.sum(jnp.exp(p - m), axis=-1, keepdims=True))
    log_q = p - (m + lse)

    tgt = tgt_ref[...]
    ids = lax.broadcasted_iota(jnp.int32, (tn, v), 1)
    onehot = ids == tgt

    eps = smoothing / vocab
    conf = 1.0 - smoothing + eps
    log_conf = math.log(conf) if conf > 0.0 else 0.0
    log_eps = math.log(eps) if eps > 0.0 else 0.0

    # off-target term + one-hot correction (no second full-tile branch):
    #   off      = eps * (log_eps - log_q)
    #   on - off = (conf*log_conf - eps*log_eps) - (1 - smoothing) * log_q
    if eps > 0.0:
        kl = eps * (log_eps - log_q)
    else:
        kl = jnp.zeros_like(log_q)                         # xlogy: 0*log(0) = 0
    corr_const = conf * log_conf - eps * log_eps
    kl = kl + jnp.where(onehot, corr_const - (1.0 - smoothing) * log_q, 0.0)

    mask = (tgt != pad_idx).astype(jnp.float32)            # (TN, 1) -> broadcast
    loss_ref[...] = (kl * mask).astype(loss_ref.dtype)


def _vmem_capacity_bytes():
    """Per-core VMEM capacity; conservative (v7x, 64 MiB) fallback."""
    try:
        return int(pltpu.get_tpu_info().vmem_capacity_bytes)
    except Exception:
        return 64 * 1024 * 1024


def _pick_row_tile(n, v, in_itemsize, elem_out_itemsize=None):
    """Row tile + vmem limit, generation aware.

    Accounts for the 2x double-buffered input block AND the ~5 full-tile f32
    temporaries the body materializes (f32 cast, exp(p-m), iota, one-hot
    select, arithmetic), plus double-buffered output blocks + log_q for the
    'none' path, so the tile fits VMEM without spilling on v5e/v6e/v7x.
    """
    cap = _vmem_capacity_bytes()
    vmem_limit = min(int(cap * 0.75), cap - (8 << 20))     # ~48 MiB v7x, ~96 MiB v5e/v6e
    budget = int(vmem_limit * 0.80)

    k_temps = 5                                            # full-tile f32 temporaries
    per_row = 2 * v * in_itemsize + k_temps * v * 4
    if elem_out_itemsize is not None:
        per_row += 2 * v * elem_out_itemsize + v * 4       # out blocks + log_q
    # TODO(synk): for very large vocabularies (100k+ classes), chunk the vocab
    # axis with an online logsumexp instead of shrinking the row tile.
    tn = budget // max(per_row, 1)
    tn = max(8, min((int(tn) // 8) * 8, 2048))
    n_round8 = -(-n // 8) * 8
    return min(tn, n_round8), vmem_limit


def label_smoothing_loss(pred, target, *, smoothing=0.1, pad_idx=0,
                         reduction="mean", none_out_dtype=None):
    """JAX/Pallas equivalent of LabelSmoothing.forward.

    pred   : [B, S, V] float (logits / log-probs; log_softmax is re-applied,
             matching the PyTorch module).  Native dtype (e.g. bf16) is fine.
    target : [B, S] integer class indices.
    """
    b, s, v = pred.shape
    n = b * s
    pred2d = pred.reshape(n, v)                            # no copy, native dtype
    tgt2d = target.reshape(n, 1).astype(jnp.int32)
    in_item = jnp.dtype(pred.dtype).itemsize

    if reduction in ("mean", "sum"):
        tn, vmem_limit = _pick_row_tile(n, v, in_item)
        grid_sz = pl.cdiv(n, tn)
        kernel = functools.partial(_ls_partial_kernel, smoothing=float(smoothing),
                                   pad_idx=int(pad_idx), vocab=v, n_rows=n)
        loss_part, cnt_part = pl.pallas_call(
            kernel,
            out_shape=(jax.ShapeDtypeStruct((8 * grid_sz, 1), jnp.float32),
                       jax.ShapeDtypeStruct((8 * grid_sz, 1), jnp.float32)),
            grid_spec=pltpu.PrefetchScalarGridSpec(
                num_scalar_prefetch=0,
                grid=(grid_sz,),
                in_specs=[
                    pl.BlockSpec((tn, v), lambda i: (i, 0)),
                    pl.BlockSpec((tn, 1), lambda i: (i, 0)),
                ],
                out_specs=[
                    pl.BlockSpec((8, 1), lambda i: (i, 0)),
                    pl.BlockSpec((8, 1), lambda i: (i, 0)),
                ],
            ),
            compiler_params=pltpu.CompilerParams(
                dimension_semantics=("parallel",),          # v7x uses both TCs
                vmem_limit_bytes=int(vmem_limit)),
        )(pred2d, tgt2d)

        loss_sum = jnp.sum(loss_part)                       # tiny (8*grid,1) reduce
        if reduction == "sum":
            return loss_sum
        return loss_sum / jnp.sum(cnt_part)

    # reduction == 'none'
    out_dtype = jnp.dtype(none_out_dtype) if none_out_dtype is not None else pred.dtype
    tn, vmem_limit = _pick_row_tile(n, v, in_item,
                                    elem_out_itemsize=jnp.dtype(out_dtype).itemsize)
    grid_sz = pl.cdiv(n, tn)
    kernel = functools.partial(_ls_elem_kernel, smoothing=float(smoothing),
                               pad_idx=int(pad_idx), vocab=v)
    loss = pl.pallas_call(
        kernel,
        out_shape=jax.ShapeDtypeStruct((n, v), out_dtype),
        grid_spec=pltpu.PrefetchScalarGridSpec(
            num_scalar_prefetch=0,
            grid=(grid_sz,),
            in_specs=[
                pl.BlockSpec((tn, v), lambda i: (i, 0)),
                pl.BlockSpec((tn, 1), lambda i: (i, 0)),
            ],
            out_specs=pl.BlockSpec((tn, v), lambda i: (i, 0)),
        ),
        compiler_params=pltpu.CompilerParams(
            dimension_semantics=("parallel",),
            vmem_limit_bytes=int(vmem_limit)),
    )(pred2d, tgt2d)
    return loss.reshape(b, s, v)


def _reference(pred, target, smoothing=0.1, pad_idx=0, reduction="mean"):
    """Pure-JAX reference mirroring the PyTorch forward, for verification."""
    b, s, v = pred.shape
    onehot = jax.nn.one_hot(target, v, dtype=jnp.float32)
    t_smooth = onehot * (1.0 - smoothing) + smoothing / v
    log_q = jax.nn.log_softmax(pred.astype(jnp.float32), axis=-1)
    loss = t_smooth * (jnp.log(t_smooth) - log_q)
    mask = (target != pad_idx).astype(jnp.float32)[..., None]
    loss = loss * mask
    if reduction == "mean":
        return loss.sum() / mask.sum()
    elif reduction == "sum":
        return loss.sum()
    return loss


if __name__ == "__main__":
    key = jax.random.PRNGKey(0)
    k_pred, k_tgt, k_pred2, k_tgt2 = jax.random.split(key, 4)

    # Case 1: batch=2, seq=8, vocab=32 (N divisible by 8).
    B, S, V = 2, 8, 32
    pred = jax.random.normal(k_pred, (B, S, V), dtype=jnp.float32)
    target = jax.random.randint(k_tgt, (B, S), minval=0, maxval=V, dtype=jnp.int32)
    target = target.at[0, 0].set(0).at[1, 3].set(0)        # pad positions

    for red in ("mean", "sum", "none"):
        out = jax.block_until_ready(
            label_smoothing_loss(pred, target, smoothing=0.1, pad_idx=0,
                                 reduction=red))
        ref = _reference(pred, target, smoothing=0.1, pad_idx=0, reduction=red)
        assert jnp.allclose(out, ref, rtol=1e-5, atol=1e-6), (red, out, ref)

    # Case 2: N not divisible by the row tile (exercises the ragged-tail mask).
    B2, S2 = 3, 5
    pred2 = jax.random.normal(k_pred2, (B2, S2, V), dtype=jnp.float32)
    target2 = jax.random.randint(k_tgt2, (B2, S2), minval=0, maxval=V, dtype=jnp.int32)
    target2 = target2.at[0, 1].set(0)

    for red in ("mean", "sum"):
        out2 = jax.block_until_ready(
            label_smoothing_loss(pred2, target2, smoothing=0.1, pad_idx=0,
                                 reduction=red))
        ref2 = _reference(pred2, target2, smoothing=0.1, pad_idx=0, reduction=red)
        assert jnp.allclose(out2, ref2, rtol=1e-5, atol=1e-6), (red, out2, ref2)

    # Case 3: bf16 inputs fed in native dtype (f32 cast happens in-VMEM).
    pred_bf16 = pred2.astype(jnp.bfloat16)
    out_bf = jax.block_until_ready(
        label_smoothing_loss(pred_bf16, target2, smoothing=0.1, pad_idx=0,
                             reduction="mean"))
    ref_bf = _reference(pred_bf16, target2, smoothing=0.1, pad_idx=0,
                        reduction="mean")
    assert jnp.allclose(out_bf, ref_bf, rtol=1e-4, atol=1e-5), (out_bf, ref_bf)

    print("KERNEL_OK")
</pallas_src>

<mosaic_0001>
module attributes {stable_mosaic.version = 11 : i64} {
  func.func @_ls_partial_kernel(%arg0: i32, %arg1: memref<16x32xf32, #tpu.memory_space<vmem>>, %arg2: memref<16x1xi32, #tpu.memory_space<vmem>>, %arg3: memref<8x1xf32, #tpu.memory_space<vmem>>, %arg4: memref<8x1xf32, #tpu.memory_space<vmem>>) attributes {dimension_semantics = [#tpu.dimension_semantics<parallel>], iteration_bounds = array<i64: 1>, scalar_prefetch = 0 : i64, scratch_operands = 0 : i64, tpu.core_type = #tpu.core_type<tc>, window_params = [{transform_indices = @transform_0, window_bounds = array<i64: 16, 32>}, {transform_indices = @transform_1, window_bounds = array<i64: 16, 1>}, {transform_indices = @transform_2, window_bounds = array<i64: 8, 1>}, {transform_indices = @transform_3, window_bounds = array<i64: 8, 1>}]} {
    %c0 = arith.constant 0 : index
    %c0_0 = arith.constant 0 : index
    %0 = vector.load %arg1[%c0, %c0_0] : memref<16x32xf32, #tpu.memory_space<vmem>>, vector<16x32xf32>
    %cst = arith.constant dense<0xFF800000> : vector<16xf32>
    %1 = vector.multi_reduction <maximumf>, %0, %cst [1] : vector<16x32xf32> to vector<16xf32>
    %2 = vector.shape_cast %1 : vector<16xf32> to vector<16x1xf32>
    %3 = vector.broadcast %2 : vector<16x1xf32> to vector<16x32xf32>
    %4 = arith.subf %0, %3 : vector<16x32xf32>
    %5 = math.exp %4 : vector<16x32xf32>
    %cst_1 = arith.constant dense<0.000000e+00> : vector<16xf32>
    %6 = vector.multi_reduction <add>, %5, %cst_1 [1] : vector<16x32xf32> to vector<16xf32>
    %7 = vector.shape_cast %6 : vector<16xf32> to vector<16x1xf32>
    %8 = math.log %7 : vector<16x1xf32>
    %9 = arith.addf %2, %8 : vector<16x1xf32>
    %cst_2 = arith.constant dense<0.000000e+00> : vector<16xf32>
    %10 = vector.multi_reduction <add>, %0, %cst_2 [1] : vector<16x32xf32> to vector<16xf32>
    %11 = vector.shape_cast %10 : vector<16xf32> to vector<16x1xf32>
    %c0_3 = arith.constant 0 : index
    %c0_4 = arith.constant 0 : index
    %12 = vector.load %arg2[%c0_3, %c0_4] : memref<16x1xi32, #tpu.memory_space<vmem>>, vector<16x1xi32>
    %13 = tpu.iota {dimensions = array<i32: 1>} : vector<16x32xi32>
    %14 = vector.broadcast %12 : vector<16x1xi32> to vector<16x32xi32>
    %15 = arith.cmpi eq, %13, %14 : vector<16x32xi32>
    %cst_5 = arith.constant 0.000000e+00 : f32
    %16 = vector.broadcast %cst_5 : f32 to vector<16x32xf32>
    %17 = arith.select %15, %0, %16 : vector<16x32xi1>, vector<16x32xf32>
    %cst_6 = arith.constant dense<0.000000e+00> : vector<16xf32>
    %18 = vector.multi_reduction <add>, %17, %cst_6 [1] : vector<16x32xf32> to vector<16xf32>
    %19 = vector.shape_cast %18 : vector<16xf32> to vector<16x1xf32>
    %cst_7 = arith.constant 3.200000e+01 : f32
    %20 = vector.broadcast %cst_7 : f32 to vector<16x1xf32>
    %21 = arith.mulf %20, %9 : vector<16x1xf32>
    %22 = arith.subf %11, %21 : vector<16x1xf32>
    %23 = arith.subf %19, %9 : vector<16x1xf32>
    %c16_i32 = arith.constant 16 : i32
    %24 = arith.muli %arg0, %c16_i32 : i32
    %25 = tpu.iota {dimensions = array<i32: 0>} : vector<16x1xi32>
    %26 = vector.broadcast %24 : i32 to vector<16x1xi32>
    %27 = arith.addi %26, %25 : vector<16x1xi32>
    %c0_i32 = arith.constant 0 : i32
    %28 = vector.broadcast %c0_i32 : i32 to vector<16x1xi32>
    %29 = arith.cmpi ne, %12, %28 : vector<16x1xi32>
    %c16_i32_8 = arith.constant 16 : i32
    %30 = vector.broadcast %c16_i32_8 : i32 to vector<16x1xi32>
    %31 = arith.cmpi slt, %27, %30 : vector<16x1xi32>
    %32 = arith.andi %29, %31 : vector<16x1xi1>
    %cst_9 = arith.constant 3.125000e-03 : f32
    %33 = vector.broadcast %cst_9 : f32 to vector<16x1xf32>
    %34 = arith.mulf %33, %22 : vector<16x1xf32>
    %cst_10 = arith.constant -0.650829374 : f32
    %35 = vector.broadcast %cst_10 : f32 to vector<16x1xf32>
    %36 = arith.subf %35, %34 : vector<16x1xf32>
    %cst_11 = arith.constant 0.899999976 : f32
    %37 = vector.broadcast %cst_11 : f32 to vector<16x1xf32>
    %38 = arith.mulf %37, %23 : vector<16x1xf32>
    %39 = arith.subf %36, %38 : vector<16x1xf32>
    %cst_12 = arith.constant 0.000000e+00 : f32
    %40 = vector.broadcast %cst_12 : f32 to vector<16x1xf32>
    %41 = arith.select %32, %39, %40 : vector<16x1xi1>, vector<16x1xf32>
    %cst_13 = arith.constant dense<0.000000e+00> : vector<1xf32>
    %42 = vector.multi_reduction <add>, %41, %cst_13 [0] : vector<16x1xf32> to vector<1xf32>
    %43 = vector.shape_cast %42 : vector<1xf32> to vector<1x1xf32>
    %44 = arith.extui %32 : vector<16x1xi1> to vector<16x1xi32>
    %45 = arith.sitofp %44 : vector<16x1xi32> to vector<16x1xf32>
    %cst_14 = arith.constant dense<0.000000e+00> : vector<1xf32>
    %46 = vector.multi_reduction <add>, %45, %cst_14 [0] : vector<16x1xf32> to vector<1xf32>
    %47 = vector.shape_cast %46 : vector<1xf32> to vector<1x1xf32>
    %48 = tpu.iota {dimensions = array<i32: 0>} : vector<8x1xi32>
    %c0_i32_15 = arith.constant 0 : i32
    %49 = vector.broadcast %c0_i32_15 : i32 to vector<8x1xi32>
    %50 = arith.cmpi eq, %48, %49 : vector<8x1xi32>
    %cst_16 = arith.constant 0.000000e+00 : f32
    %51 = vector.shape_cast %43 : vector<1x1xf32> to vector<1x1xf32>
    %52 = vector.broadcast %51 : vector<1x1xf32> to vector<8x1xf32>
    %53 = vector.broadcast %cst_16 : f32 to vector<8x1xf32>
    %54 = arith.select %50, %52, %53 : vector<8x1xi1>, vector<8x1xf32>
    %c0_17 = arith.constant 0 : index
    %c0_18 = arith.constant 0 : index
    %55 = vector.load %arg3[%c0_17, %c0_18] : memref<8x1xf32, #tpu.memory_space<vmem>>, vector<8x1xf32>
    tpu.vector_store %arg3[%c0_17, %c0_18], %54 {strides = array<i32>} : memref<8x1xf32, #tpu.memory_space<vmem>>, vector<8x1xf32>,
    %cst_19 = arith.constant 0.000000e+00 : f32
    %56 = vector.shape_cast %47 : vector<1x1xf32> to vector<1x1xf32>
    %57 = vector.broadcast %56 : vector<1x1xf32> to vector<8x1xf32>
    %58 = vector.broadcast %cst_19 : f32 to vector<8x1xf32>
    %59 = arith.select %50, %57, %58 : vector<8x1xi1>, vector<8x1xf32>
    %c0_20 = arith.constant 0 : index
    %c0_21 = arith.constant 0 : index
    %60 = vector.load %arg4[%c0_20, %c0_21] : memref<8x1xf32, #tpu.memory_space<vmem>>, vector<8x1xf32>
    tpu.vector_store %arg4[%c0_20, %c0_21], %59 {strides = array<i32>} : memref<8x1xf32, #tpu.memory_space<vmem>>, vector<8x1xf32>,
    return
  }
  func.func @transform_0(%arg0: i32) -> (i32, i32) {
    %c0_i32 = arith.constant 0 : i32
    %c0_i32_0 = arith.constant 0 : i32
    return %arg0, %c0_i32 : i32, i32
  }
  func.func @transform_1(%arg0: i32) -> (i32, i32) {
    %c0_i32 = arith.constant 0 : i32
    %c0_i32_0 = arith.constant 0 : i32
    return %arg0, %c0_i32 : i32, i32
  }
  func.func @transform_2(%arg0: i32) -> (i32, i32) {
    %c0_i32 = arith.constant 0 : i32
    %c0_i32_0 = arith.constant 0 : i32
    return %arg0, %c0_i32 : i32, i32
  }
  func.func @transform_3(%arg0: i32) -> (i32, i32) {
    %c0_i32 = arith.constant 0 : i32
    %c0_i32_0 = arith.constant 0 : i32
    return %arg0, %c0_i32 : i32, i32
  }
}

</mosaic_0001>

<bundles_post_ra>
// kernel: tpu_custom_call.1
= control target key start
LH: loop header
LB: loop body
LE: loop exit
PB: predicated region body
PF: predicated region fallthrough
CT: control target
= control target key end

     0   :  { %vm15_vm0 = vcmask 261120   ;;  %v145_v1 = vmov 0   ;;  %v146_v7 = vmov 0.0   ;;  %vm95_vm3 = vcmask 7168   ;;  %s222_s0 = inlined_call_operand.vmem [shape: f32[16,32], index: 0, kind: input, shape index: {}]   ;;  %s223_s1 = inlined_call_operand.vmem [shape: s32[16,1], index: 1, kind: input, shape index: {}]   ;;  %s224_s3 = inlined_call_operand.vmem [shape: f32[8,1], index: 3, kind: output, shape index: {1}]   ;;  %s225_s2 = inlined_call_operand.vmem [shape: f32[8,1], index: 2, kind: output, shape index: {0}]  }
   0x1   :  { %v13_v0 = vld [vmem:[%s222_s0] sm:$0xff]  ;;  %135 = vset.pattern.permute.xlu1 %v145_v1  ;;  %136 = vset.pattern.permute.xlu0 %v145_v1  ;;  %v14_v4 = vld [vmem:[%s222_s0 + $0x8] sm:$0xff]  ;;  %v48_v18 = vlaneseq }
   0x2   :  { %v173_v2 = vld [vmem:[%s223_s1] sm:$0xff]  ;;  %v16_v3 = vsel %vm15_vm0, %v13_v0, -inf  ;;  %v183_v5 = vld [vmem:[%s223_s1 + $0x8] sm:$0xff]  ;;  %v19_v6 = vsel %vm15_vm0, %v14_v4, -inf  ;;  %v40_v19 = vsel %vm15_vm0, %v13_v0, 0.0  ;;  %v43_v23 = vsel %vm15_vm0, %v14_v4, 0.0 }
   0x3   :  { %51 = vperm.xlu1 %135, %v173_v2   ;;  %17 = vmax.xlane.f32.xlu0 %v16_v3  ;;  %vm80_vm1 = vcmp.ne.s32.totalorder %v183_v5, 0  ;;  %vm79_vm2 = vcmp.ne.s32.totalorder %v173_v2, 0  ;;  %v196_v21 = vshrl.u32 %v48_v18, 7  ;;  %v49_v28 = vand.u32 127, %v48_v18 }
   0x4   :  { %v131_v8 = vsel %vm79_vm2, 1.0, %v146_v7  ;;  %v132_v9 = vsel %vm80_vm1, 1.0, %v146_v7 }
   0x5   :  { %v109_v10 = vsel %vm95_vm3, %v131_v8, 0.0  ;;  %v110_v11 = vsel %vm95_vm3, %v132_v9, 0.0  ;;  %vm118_vm4 = vcmp.eq.s32.totalorder %v196_v21, 0 }
   0x6   :  { %v111_v12 = vadd.f32 %v110_v11, %v109_v10 }
   0x8   :  { %v112_v13 = vrot.slane %v111_v12, 4 }
   0xa   :  { %v113_v14 = vadd.f32 %v112_v13, %v111_v12 }
   0xb   :  { %54 = vperm.xlu1 %135, %v183_v5   ;;  %20 = vmax.xlane.f32.xlu0 %v19_v6 }
   0xc   :  { %v114_v15 = vrot.slane %v113_v14, 2 }
   0xe   :  { %v115_v16 = vadd.f32 %v114_v15, %v113_v14 }
  0x10   :  { %v116_v17 = vrot.slane %v115_v16, 1 }
  0x12   :  { %v117_v20 = vadd.f32 %v116_v17, %v115_v16 }
  0x13   :  { %41 = vadd.xlane.f32.xlu0 %v40_v19 }
  0x14   :  { %v121_v22 = vsel %vm118_vm4, %v117_v20, 0.0 }
  0x15   :  { %122 = vst.msk [vmem:[%s224_s3] sm:$0xff] %vm95_vm3, %v121_v22 }
  0x35   :  { %44 = vadd.xlane.f32.xlu1 %v43_v23 }
  0x75   :  { %v52_v24 = vpop.permute.xlu1 %51 }
  0x76   :  { %v18_v25 = vpop.xlane.xlu0 %17  ;;  %vm56_vm6 = vcmp.eq.s32.totalorder %v49_v28, %v52_v24 }
  0x77   :  { %v22_v26 = vsub.f32 %v13_v0, %v18_v25  ;;  %v58_v39 = vsel %vm56_vm6, %v13_v0, 0.0 }
  0x78   :  { %v60_v40 = vsel %vm15_vm0, %v58_v39, 0.0 }
  0x79   :  { %v24_v27 = vmul.f32 1.442695, %v22_v26 }
  0x7b   :  { %137 = vpow2.f32 %v24_v27 }
  0x7d   :  { %v55_v29 = vpop.permute.xlu1 %54 }
  0x7e   :  { %vm57_vm5 = vcmp.eq.s32.totalorder %v49_v28, %v55_v29  ;;  %v21_v30 = vpop.xlane.xlu0 %20 }
  0x7f   :  { %v59_v31 = vsel %vm57_vm5, %v14_v4, 0.0  ;;  %v23_v32 = vsub.f32 %v14_v4, %v21_v30 }
  0x80   :  { %v63_v33 = vsel %vm15_vm0, %v59_v31, 0.0 }
  0x81   :  { %64 = vadd.xlane.f32.xlu0 %v63_v33  ;;  %v138_v34 = vpop.eup %137  ;;  %v26_v35 = vmul.f32 1.442695, %v23_v32 }
  0x82   :  { %v28_v36 = vsel %vm15_vm0, %v138_v34, 0.0 }
  0x83   :  { %139 = vpow2.f32 %v26_v35  ;;  %29 = vadd.xlane.f32.xlu2 %v28_v36 }
  0x86   :  { %v42_v46 = vpop.xlane.xlu0 %41 }
  0x89   :  { %v140_v37 = vpop.eup %139 }
  0x8a   :  { %v31_v38 = vsel %vm15_vm0, %v140_v37, 0.0 }
  0x8b   :  { %32 = vadd.xlane.f32.xlu2 %v31_v38 }
  0x93   :  { %61 = vadd.xlane.f32.xlu2 %v60_v40 }
  0xa8   :  { %v45_v55 = vpop.xlane.xlu1 %44 }
  0xf4   :  { %v65_v59 = vpop.xlane.xlu0 %64 }
  0xf6   :  { %v30_v41 = vpop.xlane.xlu2 %29 }
  0xf7   :  { %141 = vlog2.f32 %v30_v41 }
  0xfd   :  { %v142_v42 = vpop.eup %141 }
  0xfe   :  { %v35_v43 = vmul.f32 0.6931472, %v142_v42  ;;  %v33_v44 = vpop.xlane.xlu2 %32 }
  0xff   :  { %143 = vlog2.f32 %v33_v44 }
 0x100   :  { %v38_v45 = vadd.f32 %v35_v43, %v18_v25 }
 0x102   :  { %v66_v47 = vmul.f32 32.0, %v38_v45 }
 0x104   :  { %v68_v48 = vsub.f32 %v42_v46, %v66_v47 }
 0x105   :  { %v144_v49 = vpop.eup %143 }
 0x106   :  { %v85_v50 = vmul.f32 0.003125, %v68_v48  ;;  %v37_v51 = vmul.f32 0.6931472, %v144_v49  ;;  %v62_v52 = vpop.xlane.xlu2 %61 }
 0x107   :  { %v70_v53 = vsub.f32 %v62_v52, %v38_v45 }
 0x108   :  { %v39_v54 = vadd.f32 %v37_v51, %v21_v30  ;;  %v87_v56 = vsub.f32 -0.6508294, %v85_v50 }
 0x109   :  { %v89_v57 = vmul.f32 0.9, %v70_v53 }
 0x10a   :  { %v67_v58 = vmul.f32 32.0, %v39_v54  ;;  %v71_v60 = vsub.f32 %v65_v59, %v39_v54 }
 0x10b   :  { %v91_v62 = vsub.f32 %v87_v56, %v89_v57 }
 0x10c   :  { %v69_v61 = vsub.f32 %v45_v55, %v67_v58  ;;  %v90_v0 = vmul.f32 0.9, %v71_v60 }
 0x10d   :  { %v93_v3 = vsel %vm79_vm2, %v91_v62, 0.0 }
 0x10e   :  { %v86_v63 = vmul.f32 0.003125, %v69_v61  ;;  %v96_v7 = vsel %vm95_vm3, %v93_v3, 0.0 }
 0x110   :  { %v88_v1 = vsub.f32 -0.6508294, %v86_v63 }
 0x112   :  { %v92_v4 = vsub.f32 %v88_v1, %v90_v0 }
 0x114   :  { %v94_v6 = vsel %vm80_vm1, %v92_v4, 0.0 }
 0x115   :  { %v97_v8 = vsel %vm95_vm3, %v94_v6, 0.0 }
 0x116   :  { %v98_v9 = vadd.f32 %v97_v8, %v96_v7 }
 0x118   :  { %v99_v10 = vrot.slane %v98_v9, 4 }
 0x11a   :  { %v100_v11 = vadd.f32 %v99_v10, %v98_v9 }
 0x11c   :  { %v101_v12 = vrot.slane %v100_v11, 2 }
 0x11e   :  { %v102_v13 = vadd.f32 %v101_v12, %v100_v11 }
 0x120   :  { %v103_v14 = vrot.slane %v102_v13, 1 }
 0x122   :  { %v104_v15 = vadd.f32 %v103_v14, %v102_v13 }
 0x124   :  { %v119_v16 = vsel %vm118_vm4, %v104_v15, 0.0 }
 0x125   :  { %120 = vst.msk [vmem:[%s225_s2] sm:$0xff] %vm95_vm3, %v119_v16 }

</bundles_post_ra>
